<compile_context>
chip_gen: v7x
topology: tpu7x:2x2x1
jax: 0.10.0
libtpu: 0.0.40
codegen_flags: <defaults>
</compile_context>

<pallas_src>
import functools

import jax
import jax.numpy as jnp
from jax.experimental import pallas as pl
from jax.experimental.pallas import tpu as pltpu


def _round_up(n, m):
    return ((n + m - 1) // m) * m


def _mlp_encoder_kernel(*refs, apply_dropout):
    """Fused MLP encoder forward for one column-tile (lane-dense: N on lanes)."""
    if apply_dropout:
        x_ref, w1_ref, b1_ref, w2_ref, b2_ref, m1_ref, m2_ref, o_ref = refs
    else:
        x_ref, w1_ref, b1_ref, w2_ref, b2_ref, o_ref = refs
        m1_ref = m2_ref = None

    # ---- Linear 1 + ReLU :  (hidden, in) @ (in, tile_N) -> (hidden, tile_N) --
    h = jnp.dot(w1_ref[...], x_ref[...], preferred_element_type=jnp.float32)
    h = h + b1_ref[...]                       # b1 is (hidden, 1) -> broadcast over lanes
    h = jnp.maximum(h, 0.0)

    # ---- Dropout 1 (mask already scaled by 1/(1-p)) --------------------------
    if apply_dropout:
        h = h * m1_ref[...]

    # ---- Linear 2 + ReLU :  (out, hidden) @ (hidden, tile_N) -----------------
    h = h.astype(w2_ref.dtype)                # bf16 operand for the MXU, f32 accumulate
    y = jnp.dot(w2_ref[...], h, preferred_element_type=jnp.float32)
    y = y + b2_ref[...]
    y = jnp.maximum(y, 0.0)

    # ---- Dropout 2 ------------------------------------------------------------
    if apply_dropout:
        y = y * m2_ref[...]

    o_ref[...] = y.astype(o_ref.dtype)


def mlp_encoder(x, w1, b1, w2, b2, *, dropout_prob=0.1, train=False, rng_key=None,
                n_tile=None, compute_dtype=jnp.bfloat16):
    """Pallas-backed MLPEncoder forward.

    x  : (N, in_channels)  float32, node-major (like the PyTorch module)
    w1 : (hidden_channels, in_channels)   -- PyTorch nn.Linear weight layout
    b1 : (hidden_channels,)
    w2 : (out_channels, hidden_channels)
    b2 : (out_channels,)
    returns (N, out_channels) in x.dtype
    """
    N, in_ch = x.shape
    hidden = w1.shape[0]
    out_ch = w2.shape[0]
    out_dtype = x.dtype

    # --- tile selection: lane-dense, big tiles (step-overhead amortization) ---
    if n_tile is None:
        n_tile = min(2048, _round_up(N, 128))
    else:
        n_tile = _round_up(int(n_tile), 128)
    N_pad = _round_up(N, n_tile)
    grid = (N_pad // n_tile,)

    # --- lane-dense layout: features on sublanes, nodes on lanes --------------
    x_t = jnp.zeros((in_ch, N_pad), dtype=compute_dtype)
    x_t = x_t.at[:, :N].set(x.T.astype(compute_dtype))

    w1_c = w1.astype(compute_dtype)                    # (hidden, in)
    w2_c = w2.astype(compute_dtype)                    # (out, hidden)
    b1_2d = b1.reshape(hidden, 1).astype(jnp.float32)
    b2_2d = b2.reshape(out_ch, 1).astype(jnp.float32)

    apply_dropout = bool(train) and float(dropout_prob) > 0.0

    inputs = [x_t, w1_c, b1_2d, w2_c, b2_2d]
    in_specs = [
        pl.BlockSpec((in_ch, n_tile), lambda i: (0, i)),    # x column-tile
        pl.BlockSpec((hidden, in_ch), lambda i: (0, 0)),    # W1 (constant)
        pl.BlockSpec((hidden, 1),     lambda i: (0, 0)),    # b1 (constant)
        pl.BlockSpec((out_ch, hidden), lambda i: (0, 0)),   # W2 (constant)
        pl.BlockSpec((out_ch, 1),     lambda i: (0, 0)),    # b2 (constant)
    ]

    if apply_dropout:
        keep_prob = 1.0 - float(dropout_prob)
        if keep_prob <= 0.0:
            m1 = jnp.zeros((hidden, N_pad), jnp.float32)
            m2 = jnp.zeros((out_ch, N_pad), jnp.float32)
        else:
            if rng_key is None:
                rng_key = jax.random.PRNGKey(0)
            k1, k2 = jax.random.split(rng_key)
            m1 = (jax.random.bernoulli(k1, keep_prob, (hidden, N_pad))
                  .astype(jnp.float32) / keep_prob)
            m2 = (jax.random.bernoulli(k2, keep_prob, (out_ch, N_pad))
                  .astype(jnp.float32) / keep_prob)
        inputs += [m1, m2]
        in_specs += [
            pl.BlockSpec((hidden, n_tile), lambda i: (0, i)),
            pl.BlockSpec((out_ch, n_tile), lambda i: (0, i)),
        ]

    out_specs = pl.BlockSpec((out_ch, n_tile), lambda i: (0, i))
    out_shape = jax.ShapeDtypeStruct((out_ch, N_pad), out_dtype)

    # Advisory cost estimate for the XLA scheduler (kernel is memory/overhead bound).
    flops = 2 * N_pad * (in_ch * hidden + hidden * out_ch)
    bytes_accessed = sum(int(a.size) * a.dtype.itemsize for a in inputs)
    bytes_accessed += N_pad * out_ch * jnp.dtype(out_dtype).itemsize
    cost = pl.CostEstimate(flops=flops, transcendentals=0,
                           bytes_accessed=int(bytes_accessed))

    kernel = functools.partial(_mlp_encoder_kernel, apply_dropout=apply_dropout)

    out_t = pl.pallas_call(
        kernel,
        out_shape=out_shape,
        grid=grid,
        in_specs=in_specs,
        out_specs=out_specs,
        compiler_params=pltpu.CompilerParams(
            dimension_semantics=("parallel",)),   # tiles are independent -> megacore on v7x
        cost_estimate=cost,
    )(*inputs)

    # back to node-major, drop padding
    return out_t.T[:N, :]


def _ref_eval(x, w1, b1, w2, b2, compute_dtype=jnp.bfloat16):
    """Pure-JAX reference for eval mode (dropout = identity), same bf16 casts."""
    xb = x.astype(compute_dtype)
    w1b = w1.astype(compute_dtype)
    w2b = w2.astype(compute_dtype)
    h = jnp.dot(xb, w1b.T, preferred_element_type=jnp.float32) + b1
    h = jnp.maximum(h, 0.0)
    y = jnp.dot(h.astype(compute_dtype), w2b.T, preferred_element_type=jnp.float32) + b2
    return jnp.maximum(y, 0.0).astype(x.dtype)


if __name__ == "__main__":
    # Small shapes consistent with the module: N nodes with raw-feature dim 16,
    # hidden=32, d_model (out)=32.
    N, IN, HID, OUT = 256, 16, 32, 32
    P_DROP = 0.1

    key = jax.random.PRNGKey(0)
    kx, kw1, kb1, kw2, kb2, kdrop = jax.random.split(key, 6)

    x = jax.random.normal(kx, (N, IN), dtype=jnp.float32)

    # Deterministic parameter init (Kaiming-uniform-ish, like nn.Linear defaults),
    # stored in PyTorch layout: weight = (out_features, in_features).
    lim1 = 1.0 / (IN ** 0.5)
    w1 = jax.random.uniform(kw1, (HID, IN), minval=-lim1, maxval=lim1, dtype=jnp.float32)
    b1 = jax.random.uniform(kb1, (HID,),   minval=-lim1, maxval=lim1, dtype=jnp.float32)
    lim2 = 1.0 / (HID ** 0.5)
    w2 = jax.random.uniform(kw2, (OUT, HID), minval=-lim2, maxval=lim2, dtype=jnp.float32)
    b2 = jax.random.uniform(kb2, (OUT,),    minval=-lim2, maxval=lim2, dtype=jnp.float32)

    # Eval mode (dropout off): check against pure-JAX reference with matching bf16 casts.
    out_eval = mlp_encoder(x, w1, b1, w2, b2, dropout_prob=P_DROP, train=False)
    out_eval = jax.block_until_ready(out_eval)
    ref = _ref_eval(x, w1, b1, w2, b2)
    assert out_eval.shape == (N, OUT)
    assert jnp.allclose(out_eval, ref, atol=2e-2, rtol=2e-2), "eval-mode mismatch"

    # Training mode: inverted dropout (masks generated with jax.random, applied in-kernel).
    out_train = mlp_encoder(x, w1, b1, w2, b2, dropout_prob=P_DROP, train=True,
                            rng_key=kdrop)
    out_train = jax.block_until_ready(out_train)
    assert out_train.shape == (N, OUT)
    assert bool(jnp.all(jnp.isfinite(out_train)))

    print("KERNEL_OK")
</pallas_src>

<mosaic_0001>
module attributes {stable_mosaic.version = 11 : i64} {
  func.func @_mlp_encoder_kernel(%arg0: i32, %arg1: memref<16x256xbf16, #tpu.memory_space<vmem>>, %arg2: memref<32x16xbf16, #tpu.memory_space<vmem>>, %arg3: memref<32x1xf32, #tpu.memory_space<vmem>>, %arg4: memref<32x32xbf16, #tpu.memory_space<vmem>>, %arg5: memref<32x1xf32, #tpu.memory_space<vmem>>, %arg6: memref<32x256xf32, #tpu.memory_space<vmem>>) attributes {dimension_semantics = [#tpu.dimension_semantics<parallel>], iteration_bounds = array<i64: 1>, scalar_prefetch = 0 : i64, scratch_operands = 0 : i64, tpu.core_type = #tpu.core_type<tc>, window_params = [{transform_indices = @transform_0, window_bounds = array<i64: 16, 256>}, {pipeline_mode = #tpu.pipeline_mode<synchronous>, transform_indices = @transform_1, window_bounds = array<i64: 32, 16>}, {pipeline_mode = #tpu.pipeline_mode<synchronous>, transform_indices = @transform_2, window_bounds = array<i64: 32, 1>}, {pipeline_mode = #tpu.pipeline_mode<synchronous>, transform_indices = @transform_3, window_bounds = array<i64: 32, 32>}, {pipeline_mode = #tpu.pipeline_mode<synchronous>, transform_indices = @transform_4, window_bounds = array<i64: 32, 1>}, {transform_indices = @transform_5, window_bounds = array<i64: 32, 256>}]} {
    %c0 = arith.constant 0 : index
    %c0_0 = arith.constant 0 : index
    %0 = vector.load %arg2[%c0, %c0_0] : memref<32x16xbf16, #tpu.memory_space<vmem>>, vector<32x16xbf16>
    %c0_1 = arith.constant 0 : index
    %c0_2 = arith.constant 0 : index
    %1 = vector.load %arg1[%c0_1, %c0_2] : memref<16x256xbf16, #tpu.memory_space<vmem>>, vector<16x256xbf16>
    %cst = arith.constant dense<0.000000e+00> : vector<32x256xf32>
    %2 = tpu.matmul %0, %1, %cst {dimension_numbers = #tpu.dot_dimension_numbers<[1], [0], [0], [1], [0, 0, 1, 1], [], []>} : vector<32x16xbf16>, vector<16x256xbf16>, vector<32x256xf32> -> vector<32x256xf32>
    %c0_3 = arith.constant 0 : index
    %c0_4 = arith.constant 0 : index
    %3 = vector.load %arg3[%c0_3, %c0_4] : memref<32x1xf32, #tpu.memory_space<vmem>>, vector<32x1xf32>
    %4 = vector.broadcast %3 : vector<32x1xf32> to vector<32x256xf32>
    %5 = arith.addf %2, %4 : vector<32x256xf32>
    %cst_5 = arith.constant 0.000000e+00 : f32
    %6 = vector.broadcast %cst_5 : f32 to vector<32x256xf32>
    %7 = arith.maximumf %5, %6 : vector<32x256xf32>
    %8 = arith.truncf %7 : vector<32x256xf32> to vector<32x256xbf16>
    %c0_6 = arith.constant 0 : index
    %c0_7 = arith.constant 0 : index
    %9 = vector.load %arg4[%c0_6, %c0_7] : memref<32x32xbf16, #tpu.memory_space<vmem>>, vector<32x32xbf16>
    %cst_8 = arith.constant dense<0.000000e+00> : vector<32x256xf32>
    %10 = tpu.matmul %9, %8, %cst_8 {dimension_numbers = #tpu.dot_dimension_numbers<[1], [0], [0], [1], [0, 0, 1, 1], [], []>} : vector<32x32xbf16>, vector<32x256xbf16>, vector<32x256xf32> -> vector<32x256xf32>
    %c0_9 = arith.constant 0 : index
    %c0_10 = arith.constant 0 : index
    %11 = vector.load %arg5[%c0_9, %c0_10] : memref<32x1xf32, #tpu.memory_space<vmem>>, vector<32x1xf32>
    %12 = vector.broadcast %11 : vector<32x1xf32> to vector<32x256xf32>
    %13 = arith.addf %10, %12 : vector<32x256xf32>
    %cst_11 = arith.constant 0.000000e+00 : f32
    %14 = vector.broadcast %cst_11 : f32 to vector<32x256xf32>
    %15 = arith.maximumf %13, %14 : vector<32x256xf32>
    %c0_12 = arith.constant 0 : index
    %c0_13 = arith.constant 0 : index
    %16 = vector.load %arg6[%c0_12, %c0_13] : memref<32x256xf32, #tpu.memory_space<vmem>>, vector<32x256xf32>
    tpu.vector_store %arg6[%c0_12, %c0_13], %15 {strides = array<i32>} : memref<32x256xf32, #tpu.memory_space<vmem>>, vector<32x256xf32>,
    return
  }
  func.func @transform_0(%arg0: i32) -> (i32, i32) {
    %c0_i32 = arith.constant 0 : i32
    %c0_i32_0 = arith.constant 0 : i32
    return %c0_i32, %arg0 : i32, i32
  }
  func.func @transform_1(%arg0: i32) -> (i32, i32) {
    %c0_i32 = arith.constant 0 : i32
    %c0_i32_0 = arith.constant 0 : i32
    %c0_i32_1 = arith.constant 0 : i32
    return %c0_i32, %c0_i32_0 : i32, i32
  }
  func.func @transform_2(%arg0: i32) -> (i32, i32) {
    %c0_i32 = arith.constant 0 : i32
    %c0_i32_0 = arith.constant 0 : i32
    %c0_i32_1 = arith.constant 0 : i32
    return %c0_i32, %c0_i32_0 : i32, i32
  }
  func.func @transform_3(%arg0: i32) -> (i32, i32) {
    %c0_i32 = arith.constant 0 : i32
    %c0_i32_0 = arith.constant 0 : i32
    %c0_i32_1 = arith.constant 0 : i32
    return %c0_i32, %c0_i32_0 : i32, i32
  }
  func.func @transform_4(%arg0: i32) -> (i32, i32) {
    %c0_i32 = arith.constant 0 : i32
    %c0_i32_0 = arith.constant 0 : i32
    %c0_i32_1 = arith.constant 0 : i32
    return %c0_i32, %c0_i32_0 : i32, i32
  }
  func.func @transform_5(%arg0: i32) -> (i32, i32) {
    %c0_i32 = arith.constant 0 : i32
    %c0_i32_0 = arith.constant 0 : i32
    return %c0_i32, %arg0 : i32, i32
  }
}

</mosaic_0001>

<bundles_post_ra>
// kernel: tpu_custom_call.1
= control target key start
LH: loop header
LB: loop body
LE: loop exit
PB: predicated region body
PF: predicated region fallthrough
CT: control target
= control target key end

     0   :  { %v321_v2 = vmov 0   ;;  %vm72_vm0 = vcmask 130048   ;;  %s417_s0 = inlined_call_operand.vmem [shape: bf16[16,256], index: 0, kind: input, shape index: {}]   ;;  %s418_s1 = inlined_call_operand.vmem [shape: bf16[32,16], index: 1, kind: input, shape index: {}]   ;;  %s419_s2 = inlined_call_operand.vmem [shape: f32[32,1], index: 2, kind: input, shape index: {}]   ;;  %s420_s3 = inlined_call_operand.vmem [shape: bf16[32,32], index: 3, kind: input, shape index: {}]   ;;  %s421_s4 = inlined_call_operand.vmem [shape: f32[32,1], index: 4, kind: input, shape index: {}]   ;;  %s422_s5 = inlined_call_operand.hbm [shape: f32[32,256], index: 5, kind: output, shape index: {}]  }
   0x1   :  { %v290_v0 = vld [vmem:[%s417_s0 + $0x4] ss:$8 sps:$4 sm:$0xff]   ;;  %v292_v1 = vld [vmem:[%s417_s0] ss:$8 sps:$4 sm:$0xff]   ;;  %111 = vmatprep.mubr.bf16.mxu0 %v321_v2  ;;  %288 = vset.pattern.permute.xlu0 %v321_v2  ;;  %v30_v5 = vld [vmem:[%s419_s2 + $0x10] sm:$0xff] }
   0x2   :  { %79 = vmatprep.subr.bf16.mxu0 %v290_v0  ;;  %v293_v3 = vld [vmem:[%s418_s1] sm:$0xff]   ;;  %289 = vset.pattern.permute.xlu1 %v321_v2  ;;  %v29_v6 = vld [vmem:[%s419_s2 + $0x8] sm:$0xff]  ;;  %v31_v7 = vld [vmem:[%s419_s2 + $0x18] sm:$0xff] }
   0x3   :  { %80 = vmatpush1.bf16.msra.mxu0 %v292_v1  ;;  %v28_v4 = vld [vmem:[%s419_s2] sm:$0xff]  ;;  %221 = vmatprep.mubr.bf16.mxu1 %v321_v2 }
   0x4   :  { %34 = vperm.xlu0 %288, %v28_v4   ;;  %44 = vperm.xlu1 %289, %v30_v5  }
   0x6   :  { %278 = vmatmul.mubr.msk.bf16.vlgmr.msra.gmra.mrb[0].mxu0 %vm72_vm0, %v293_v3 }
   0x7   :  { %121 = vmatprep.mubr.bf16.mxu0 %v321_v2 }
   0x8   :  { %10 = vsyncpa [#allocation3], 0  ;;  %39 = vperm.xlu0 %288, %v29_v6   ;;  %49 = vperm.xlu1 %289, %v31_v7   ;;  %v148_v8 = vld [vmem:[%s421_s4] sm:$0xff]  ;;  %v149_v9 = vld [vmem:[%s421_s4 + $0x8] sm:$0xff]  ;;  %vm182_vm1 = vcmask 261120  }
   0x9   :  { %v294_v10 = vld [vmem:[%s418_s1 + $0x8] sm:$0xff]   ;;  %v150_v11 = vld [vmem:[%s421_s4 + $0x10] sm:$0xff]  ;;  %v151_v12 = vld [vmem:[%s421_s4 + $0x18] sm:$0xff] }
   0xa   :  { %v295_v45 = vld [vmem:[%s420_s3] sm:$0xff]   ;;  %v296_v46 = vld [vmem:[%s420_s3 + $0x8] sm:$0xff]   ;;  %s322_s3 = smov [#allocation2]  }
   0xb   :  { %s263_s17 = sshll.u32 %s322_s3, 4  ;;  %s264_s17 = int_to_ptr.vmem [resolvable:$true] %s263_s17 }
   0xc   :  { %154 = vperm.xlu0 %288, %v148_v8   ;;  %159 = vperm.xlu1 %289, %v149_v9   ;;  %s297_s18 = scalar_lea.vmem %s264_s17, 1024  ;;  %p302_p1 = scmp.lt.s32.totalorder %s264_s17, %s264_s17 }
   0xd   :  { %p298_p0 = scmp.ne.s32.totalorder %s264_s17, %s297_s18  ;;  %p303_p2 = scmp.lt.s32.totalorder %s297_s18, %s297_s18 }
   0xe   :  { %279 = vmatmul.mubr.msk.bf16.gmra.mrb[4].mxu0 %vm72_vm0, %v294_v10 }
   0xf   :  { %p304_p3 = por %p303_p2, %p302_p1 }
  0x10   :  { %164 = vperm.xlu0 %288, %v150_v11   ;;  %169 = vperm.xlu1 %289, %v151_v12  }
  0x11   :  { %p305_p4 = pnand %p304_p3, %p298_p0 }
  0x83   :  { %v35_v13 = vpop.permute.xlu0 %34  ;;  %v45_v22 = vpop.permute.xlu1 %44 }
  0x87   :  { %v40_v17 = vpop.permute.xlu0 %39  ;;  %v50_v33 = vpop.permute.xlu1 %49 }
  0x8b   :  { %v155_v47 = vpop.permute.xlu0 %154  ;;  %v160_v51 = vpop.permute.xlu1 %159 }
  0x8f   :  { %v165_v61 = vpop.permute.xlu0 %164  ;;  %v170_v1 = vpop.permute.xlu1 %169 }
  0xd9   :  { %v113_v14 = vpop.f32.mrb[0].mxu0 }
  0xda   :  { %v114_v15 = vadd.f32 %v113_v14, %v35_v13  ;;  %v115_v16 = vpop.f32.mrb[1].mxu0 }
  0xdb   :  { %v116_v18 = vadd.f32 %v115_v16, %v35_v13  ;;  %v117_v19 = vpop.f32.mrb[2].mxu0 }
  0xdc   :  { %v118_v20 = vadd.f32 %v117_v19, %v40_v17  ;;  %v119_v21 = vpop.f32.mrb[3].mxu0  ;;  %v132_v24 = vmax.f32 %v114_v15, 0.0 }
  0xdd   :  { %v120_v23 = vadd.f32 %v119_v21, %v40_v17  ;;  %v133_v26 = vmax.f32 %v116_v18, 0.0 }
  0xde   :  { %v134_v25 = vmax.f32 %v118_v20, 0.0 }
  0xdf   :  { %v135_v27 = vmax.f32 %v120_v23, 0.0 }
  0xe0   :  { %v140_v28 = vpack.c.bf16 %v134_v25, %v132_v24 }
  0xe1   :  { %v123_v29 = vpop.f32.mrb[4].mxu0  ;;  %v141_v30 = vpack.c.bf16 %v135_v27, %v133_v26 }
  0xe2   :  { %v124_v31 = vadd.f32 %v123_v29, %v45_v22  ;;  %v125_v32 = vpop.f32.mrb[5].mxu0 }
  0xe3   :  { %v126_v34 = vadd.f32 %v125_v32, %v45_v22  ;;  %v127_v35 = vpop.f32.mrb[6].mxu0  ;;  %189 = vmatprep.subr.bf16.mxu1 %v141_v30 }
  0xe4   :  { %v128_v36 = vadd.f32 %v127_v35, %v50_v33  ;;  %v129_v37 = vpop.f32.mrb[7].mxu0  ;;  %190 = vmatpush1.bf16.msra.mxu1 %v140_v28  ;;  %v136_v39 = vmax.f32 %v124_v31, 0.0 }
  0xe5   :  { %v130_v38 = vadd.f32 %v129_v37, %v50_v33  ;;  %v137_v41 = vmax.f32 %v126_v34, 0.0 }
  0xe6   :  { %v138_v40 = vmax.f32 %v128_v36, 0.0 }
  0xe7   :  { %v139_v42 = vmax.f32 %v130_v38, 0.0 }
  0xe8   :  { %v142_v43 = vpack.c.bf16 %v138_v40, %v136_v39 }
  0xe9   :  { %v143_v44 = vpack.c.bf16 %v139_v42, %v137_v41 }
  0xeb   :  { %191 = vmatprep.subr.bf16.mxu1 %v143_v44 }
  0xec   :  { %192 = vmatpush1.bf16.msra.mxu1 %v142_v43 }
  0xef   :  { %282 = vmatmul.mubr.msk.bf16.vlgmr.msra.gmra.mrb[0].mxu1 %vm182_vm1, %v295_v45 }
  0xf0   :  { %231 = vmatprep.mubr.bf16.mxu1 %v321_v2 }
  0xf7   :  { %283 = vmatmul.mubr.msk.bf16.gmra.mrb[4].mxu1 %vm182_vm1, %v296_v46 }
 0x1c2   :  { %v223_v48 = vpop.f32.mrb[0].mxu1 }
 0x1c3   :  { %v224_v49 = vadd.f32 %v223_v48, %v155_v47  ;;  %v225_v50 = vpop.f32.mrb[1].mxu1 }
 0x1c4   :  { %v226_v52 = vadd.f32 %v225_v50, %v155_v47  ;;  %v227_v53 = vpop.f32.mrb[2].mxu1 }
 0x1c5   :  { %v242_v54 = vmax.f32 %v224_v49, 0.0  ;;  %v228_v55 = vadd.f32 %v227_v53, %v160_v51  ;;  %v229_v56 = vpop.f32.mrb[3].mxu1 }
 0x1c6   :  { %v243_v57 = vmax.f32 %v226_v52, 0.0  ;;  %v230_v58 = vadd.f32 %v229_v56, %v160_v51 }
 0x1c7   :  { %250 = vst [vmem:[#allocation2] sm:$0xff] %v242_v54  ;;  %v244_v59 = vmax.f32 %v228_v55, 0.0 }
 0x1c8   :  { %251 = vst [vmem:[#allocation2 + $0x8] sm:$0xff] %v243_v57  ;;  %v245_v60 = vmax.f32 %v230_v58, 0.0 }
 0x1c9   :  { %252 = vst [vmem:[#allocation2 + $0x10] sm:$0xff] %v244_v59 }
 0x1ca   :  { %253 = vst [vmem:[#allocation2 + $0x18] sm:$0xff] %v245_v60  ;;  %v233_v62 = vpop.f32.mrb[4].mxu1 }
 0x1cb   :  { %v234_v63 = vadd.f32 %v233_v62, %v165_v61  ;;  %v235_v0 = vpop.f32.mrb[5].mxu1 }
 0x1cc   :  { %v236_v2 = vadd.f32 %v235_v0, %v165_v61  ;;  %v237_v3 = vpop.f32.mrb[6].mxu1 }
 0x1cd   :  { %v246_v4 = vmax.f32 %v234_v63, 0.0  ;;  %v238_v5 = vadd.f32 %v237_v3, %v170_v1  ;;  %v239_v6 = vpop.f32.mrb[7].mxu1 }
 0x1ce   :  { %v247_v7 = vmax.f32 %v236_v2, 0.0  ;;  %v240_v8 = vadd.f32 %v239_v6, %v170_v1 }
 0x1cf   :  { %254 = vst [vmem:[#allocation2 + $0x20] sm:$0xff] %v246_v4  ;;  %v248_v9 = vmax.f32 %v238_v5, 0.0 }
 0x1d0   :  { %255 = vst [vmem:[#allocation2 + $0x28] sm:$0xff] %v247_v7  ;;  %v249_v10 = vmax.f32 %v240_v8, 0.0 }
 0x1d1   :  { %256 = vst [vmem:[#allocation2 + $0x30] sm:$0xff] %v248_v9 }
 0x1d2   :  { %257 = vst [vmem:[#allocation2 + $0x38] sm:$0xff] %v249_v10 }
 0x1d3   :  { %308 = shalt.err (!%p305_p4)
}
 0x1d4   :  { %s309_s21 = scalar_lea.hbm %s422_s5, 1024 }
 0x1d5   :  { %p310_p5 = scmp.ne.s32.totalorder %s422_s5, %s309_s21  ;;  %p313_p6 = scmp.lt.u32.totalorder %s309_s21, %s422_s5 }
 0x1d7   :  { %p315_p7 = pnand %p313_p6, %p310_p5 }
 0x1d9   :  { %318 = shalt.err (!%p315_p7)
}
 0x1da   :  { %s323_s26 = smov 256   ;;  %s324_s0 = smov 16  }
 0x1db   :  { %269 = dma.vmem_to_hbm [thread:$0]  %s264_s17, 1024, %s422_s5, [#allocation3], %s323_s26, %s323_s26, %s324_s0  }
 0x1dc   :  { %319 = dma.done.wait [#allocation3], 1024  }
 0x1dd   :  { %320 = vsyncadd [#allocation3], 4294966272 }
 0x1de   :  { %273 = vsyncpa [#allocation3], 1 }

</bundles_post_ra>
